<compile_context>
chip_gen: v7x
topology: tpu7x:2x2x1
jax: 0.10.0
libtpu: 0.0.40
codegen_flags: <defaults>
</compile_context>

<pallas_src>
import math

import jax
import jax.numpy as jnp
from jax.experimental import pallas as pl
from jax.experimental.pallas import tpu as pltpu


def _round_up(x, m):
    return ((x + m - 1) // m) * m


def _pca_fused_kernel(w_ref, w1_ref, e1_ref, e2_ref, out_ref):
    # w_ref : (C, D1), e1_ref: (D1, TILE_N) -> rows [:C]  of out_ref (lane-dense)
    # w1_ref: (C, D2), e2_ref: (D2, TILE_N) -> rows [C:]  of out_ref
    C = w_ref.shape[0]
    s0 = jax.lax.dot_general(
        w_ref[...], e1_ref[...],
        dimension_numbers=(((1,), (0,)), ((), ())),
        preferred_element_type=jnp.float32,
    )
    s1 = jax.lax.dot_general(
        w1_ref[...], e2_ref[...],
        dimension_numbers=(((1,), (0,)), ((), ())),
        preferred_element_type=jnp.float32,
    )
    out_ref[0:C, :] = s0.astype(out_ref.dtype)
    out_ref[C:, :] = s1.astype(out_ref.dtype)


def pca_scores_fused(weight, weight1, embeds1, embeds2, *, tile_n=8192):
    """Computes ((weight @ embeds1).T, (weight1 @ embeds2).T) in one fused,
    N-tiled Pallas call.  Outputs are float32, shape (N, C) each."""
    C, D1 = weight.shape
    C1, D2 = weight1.shape
    assert C == C1, "weight / weight1 must share num_classes"
    assert embeds1.shape[0] == D1 and embeds2.shape[0] == D2
    N = embeds1.shape[1]
    assert embeds2.shape[1] == N, "embeds1 / embeds2 must share num_nodes"

    # Accept whatever dtype inter1 emits (bf16 preferred: halves embeds HBM
    # traffic).  Never cast the big embeds here -- only the tiny weights.
    in_dtype = embeds1.dtype
    assert embeds2.dtype == in_dtype, "embeds1 / embeds2 must share dtype"
    if weight.dtype != in_dtype:
        weight = weight.astype(in_dtype)
    if weight1.dtype != in_dtype:
        weight1 = weight1.astype(in_dtype)
    in_itemsize = jnp.dtype(in_dtype).itemsize

    # ---- tile_n selection -------------------------------------------------
    tile_n = _round_up(max(int(tile_n), 128), 128)
    # Keep >= 2 grid steps when N allows it (v7x megacore: the "parallel" N
    # axis is what shards work across the two TensorCores).
    tile_n = min(tile_n, max(128, _round_up(-(-N // 2), 128)))
    # Keep the double-buffered footprint comfortably under the 32 MiB scoped
    # VMEM limit (and v7x's 64 MiB physical per TC).
    bytes_per_col_2buf = 2 * ((D1 + D2) * in_itemsize + 2 * C * 4)
    vmem_budget = 24 * 1024 * 1024
    max_tile = max(128, (vmem_budget // bytes_per_col_2buf) // 128 * 128)
    tile_n = min(tile_n, max_tile)

    grid = (pl.cdiv(N, tile_n),)

    w_itemsize = jnp.dtype(weight.dtype).itemsize
    cost = pl.CostEstimate(
        flops=2 * C * N * (D1 + D2),
        transcendentals=0,
        bytes_accessed=(
            (D1 + D2) * N * in_itemsize       # embeds (read once, no pad pass)
            + C * (D1 + D2) * w_itemsize      # weights (resident)
            + 2 * C * N * 4                   # single stacked f32 output
        ),
    )

    stacked_cn = pl.pallas_call(
        _pca_fused_kernel,
        out_shape=jax.ShapeDtypeStruct((2 * C, N), jnp.float32),
        grid=grid,
        in_specs=[
            pl.BlockSpec((C, D1), lambda n: (0, 0)),        # weight  (resident)
            pl.BlockSpec((C, D2), lambda n: (0, 0)),        # weight1 (resident)
            pl.BlockSpec((D1, tile_n), lambda n: (0, n)),   # embeds1 tile
            pl.BlockSpec((D2, tile_n), lambda n: (0, n)),   # embeds2 tile
        ],
        out_specs=pl.BlockSpec((2 * C, tile_n), lambda n: (0, n)),
        compiler_params=pltpu.CompilerParams(
            dimension_semantics=("parallel",),
            vmem_limit_bytes=32 * 1024 * 1024,
        ),
        cost_estimate=cost,
    )(weight, weight1, embeds1, embeds2)

    # Single transpose of the stacked (2C, N) slab, then cheap column splits.
    stacked_nc = stacked_cn.T                     # (N, 2C)
    return stacked_nc[:, :C], stacked_nc[:, C:]


def xavier_uniform(key, shape, dtype=jnp.float32):
    """Matches torch.nn.init.xavier_uniform_ (gain=1) for a 2-D tensor."""
    fan_out, fan_in = shape
    bound = math.sqrt(6.0 / (fan_in + fan_out))
    return jax.random.uniform(key, shape, dtype=dtype, minval=-bound, maxval=bound)


def pca_layer_forward(weight, weight1, embeds1, embeds2, inter_loss, *,
                      tile_n=8192):
    """Replicates PCALayer.forward given the outputs of inter1."""
    scores_t, scores1_t = pca_scores_fused(
        weight, weight1, embeds1, embeds2, tile_n=tile_n)
    return scores_t, scores1_t, inter_loss


if __name__ == "__main__":
    # Small, deterministic shapes consistent with the module.
    num_classes = 2
    embed_dim = 32       # inter1.embed_dim
    mlp_num_feat = 16    # inter1.mlp_num_feat
    num_nodes = 200      # not a multiple of 128 -> exercises ragged edge block

    key = jax.random.PRNGKey(0)
    k_w, k_w1, k_e1, k_e2 = jax.random.split(key, 4)

    # Parameters (xavier_uniform, as in __init__).
    weight = xavier_uniform(k_w, (num_classes, embed_dim))
    weight1 = xavier_uniform(k_w1, (num_classes, mlp_num_feat))

    # Synthetic inter1 outputs (embed_dim x num_nodes), loss = 0.0 stub.
    embeds1 = jax.random.normal(k_e1, (embed_dim, num_nodes), dtype=jnp.float32)
    embeds2 = jax.random.normal(k_e2, (mlp_num_feat, num_nodes), dtype=jnp.float32)
    inter_loss = jnp.float32(0.0)

    # f32 path: tile_n is capped internally to 128 here -> 2-step parallel
    # grid with a ragged (masked) last block and no padding pass.
    scores_t, scores1_t, loss = pca_layer_forward(
        weight, weight1, embeds1, embeds2, inter_loss)
    jax.block_until_ready((scores_t, scores1_t, loss))

    ref_scores_t = (weight @ embeds1).T
    ref_scores1_t = (weight1 @ embeds2).T
    assert scores_t.shape == (num_nodes, num_classes)
    assert scores1_t.shape == (num_nodes, num_classes)
    assert jnp.allclose(scores_t, ref_scores_t, atol=1e-5, rtol=1e-5)
    assert jnp.allclose(scores1_t, ref_scores1_t, atol=1e-5, rtol=1e-5)
    assert float(loss) == 0.0

    # bf16-input path: inter1 emits bf16 embeds directly (no wrapper cast of
    # the big arrays; only the tiny weights are cast inside the wrapper).
    embeds1_bf = jax.random.normal(k_e1, (embed_dim, num_nodes)).astype(jnp.bfloat16)
    embeds2_bf = jax.random.normal(k_e2, (mlp_num_feat, num_nodes)).astype(jnp.bfloat16)
    scores_bf, scores1_bf, _ = pca_layer_forward(
        weight, weight1, embeds1_bf, embeds2_bf, inter_loss)
    jax.block_until_ready((scores_bf, scores1_bf))
    ref_bf = (weight.astype(jnp.bfloat16) @ embeds1_bf).astype(jnp.float32).T
    ref1_bf = (weight1.astype(jnp.bfloat16) @ embeds2_bf).astype(jnp.float32).T
    assert jnp.allclose(scores_bf, ref_bf, atol=1e-1, rtol=5e-2)
    assert jnp.allclose(scores1_bf, ref1_bf, atol=1e-1, rtol=5e-2)

    print("KERNEL_OK")
</pallas_src>

<mosaic_0001>
module attributes {stable_mosaic.version = 11 : i64} {
  func.func @_pca_fused_kernel(%arg0: i32, %arg1: memref<2x32xf32, #tpu.memory_space<vmem>>, %arg2: memref<2x16xf32, #tpu.memory_space<vmem>>, %arg3: memref<32x128xf32, #tpu.memory_space<vmem>>, %arg4: memref<16x128xf32, #tpu.memory_space<vmem>>, %arg5: memref<4x128xf32, #tpu.memory_space<vmem>>) attributes {dimension_semantics = [#tpu.dimension_semantics<parallel>], iteration_bounds = array<i64: 2>, scalar_prefetch = 0 : i64, scratch_operands = 0 : i64, tpu.core_type = #tpu.core_type<tc>, window_params = [{pipeline_mode = #tpu.pipeline_mode<synchronous>, transform_indices = @transform_0, window_bounds = array<i64: 2, 32>}, {pipeline_mode = #tpu.pipeline_mode<synchronous>, transform_indices = @transform_1, window_bounds = array<i64: 2, 16>}, {transform_indices = @transform_2, window_bounds = array<i64: 32, 128>}, {transform_indices = @transform_3, window_bounds = array<i64: 16, 128>}, {transform_indices = @transform_4, window_bounds = array<i64: 4, 128>}]} {
    %c0 = arith.constant 0 : index
    %c0_0 = arith.constant 0 : index
    %0 = vector.load %arg1[%c0, %c0_0] : memref<2x32xf32, #tpu.memory_space<vmem>>, vector<2x32xf32>
    %c0_1 = arith.constant 0 : index
    %c0_2 = arith.constant 0 : index
    %1 = vector.load %arg3[%c0_1, %c0_2] : memref<32x128xf32, #tpu.memory_space<vmem>>, vector<32x128xf32>
    %cst = arith.constant dense<0.000000e+00> : vector<2x128xf32>
    %2 = tpu.matmul %0, %1, %cst {dimension_numbers = #tpu.dot_dimension_numbers<[1], [0], [0], [1], [0, 0, 1, 1], [], []>} : vector<2x32xf32>, vector<32x128xf32>, vector<2x128xf32> -> vector<2x128xf32>
    %c0_3 = arith.constant 0 : index
    %c0_4 = arith.constant 0 : index
    %3 = vector.load %arg2[%c0_3, %c0_4] : memref<2x16xf32, #tpu.memory_space<vmem>>, vector<2x16xf32>
    %c0_5 = arith.constant 0 : index
    %c0_6 = arith.constant 0 : index
    %4 = vector.load %arg4[%c0_5, %c0_6] : memref<16x128xf32, #tpu.memory_space<vmem>>, vector<16x128xf32>
    %cst_7 = arith.constant dense<0.000000e+00> : vector<2x128xf32>
    %5 = tpu.matmul %3, %4, %cst_7 {dimension_numbers = #tpu.dot_dimension_numbers<[1], [0], [0], [1], [0, 0, 1, 1], [], []>} : vector<2x16xf32>, vector<16x128xf32>, vector<2x128xf32> -> vector<2x128xf32>
    %c0_8 = arith.constant 0 : index
    %c0_9 = arith.constant 0 : index
    %6 = vector.load %arg5[%c0_8, %c0_9] : memref<4x128xf32, #tpu.memory_space<vmem>>, vector<2x128xf32>
    tpu.vector_store %arg5[%c0_8, %c0_9], %2 {strides = array<i32>} : memref<4x128xf32, #tpu.memory_space<vmem>>, vector<2x128xf32>,
    %c2 = arith.constant 2 : index
    %c0_10 = arith.constant 0 : index
    %7 = vector.load %arg5[%c2, %c0_10] : memref<4x128xf32, #tpu.memory_space<vmem>>, vector<2x128xf32>
    tpu.vector_store %arg5[%c2, %c0_10], %5 {strides = array<i32>} : memref<4x128xf32, #tpu.memory_space<vmem>>, vector<2x128xf32>,
    return
  }
  func.func @transform_0(%arg0: i32) -> (i32, i32) {
    %c0_i32 = arith.constant 0 : i32
    %c0_i32_0 = arith.constant 0 : i32
    %c0_i32_1 = arith.constant 0 : i32
    return %c0_i32, %c0_i32_0 : i32, i32
  }
  func.func @transform_1(%arg0: i32) -> (i32, i32) {
    %c0_i32 = arith.constant 0 : i32
    %c0_i32_0 = arith.constant 0 : i32
    %c0_i32_1 = arith.constant 0 : i32
    return %c0_i32, %c0_i32_0 : i32, i32
  }
  func.func @transform_2(%arg0: i32) -> (i32, i32) {
    %c0_i32 = arith.constant 0 : i32
    %c0_i32_0 = arith.constant 0 : i32
    return %c0_i32, %arg0 : i32, i32
  }
  func.func @transform_3(%arg0: i32) -> (i32, i32) {
    %c0_i32 = arith.constant 0 : i32
    %c0_i32_0 = arith.constant 0 : i32
    return %c0_i32, %arg0 : i32, i32
  }
  func.func @transform_4(%arg0: i32) -> (i32, i32) {
    %c0_i32 = arith.constant 0 : i32
    %c0_i32_0 = arith.constant 0 : i32
    return %c0_i32, %arg0 : i32, i32
  }
}

</mosaic_0001>

<bundles_post_ra>
// kernel: tpu_custom_call.1
= control target key start
LH: loop header
LB: loop body
LE: loop exit
PB: predicated region body
PF: predicated region fallthrough
CT: control target
= control target key end

     0   :  { %9 = vsyncpa [#allocation3], 0  ;;  %s1107_s0 = inlined_call_operand.hbm [shape: f32[2,32], index: 0, kind: input, shape index: {}]   ;;  %s1108_s1 = inlined_call_operand.vmem [shape: f32[2,16], index: 1, kind: input, shape index: {}]   ;;  %s1109_s2 = inlined_call_operand.hbm [shape: f32[32,200], index: 2, kind: input, shape index: {}]   ;;  %s1110_s3 = inlined_call_operand.hbm [shape: f32[16,200], index: 3, kind: input, shape index: {}]   ;;  %s1111_s4 = inlined_call_operand.hbm [shape: f32[4,200], index: 4, kind: output, shape index: {}]  }
   0x1   :  { %10 = vsyncpa [#allocation6], 0 }
   0x2   :  { %12 = vsyncpa [#allocation6 + $0x1], 0 }
   0x3   :  { %13 = vsyncpa [#allocation4], 0 }
   0x4   :  { %15 = vsyncpa [#allocation4 + $0x1], 0  ;;  %s855_s15 = smov 0   ;;  %s857_s16 = smov 0  }
   0x5   :  { %s859_s17 = smov 0   ;;  %s861_s18 = smov 0  }
   0x6 LB: > { %s876_s19 = sadd.s32 1, %s818_s18   ;;  %s70_s20 = sadd.s32 1, %s814_s17  ;;  %s818_s18 = sphi %s861_s18, %s1134_s18   ;;  %s814_s17 = sphi %s859_s17, %s1133_s17   ;;  %s810_s16 = sphi %s857_s16, %s1132_s16   ;;  %s806_s15 = sphi %s855_s15, %s1131_s15  }
   0x7   : > { %s67_s21 = ssub.s32 %s818_s18, %s876_s19  ;;  %p77_p0 = scmp.ne.s32.totalorder %s814_s17, %s810_s16 }
   0x8   : > { %p68_p1 = scmp.eq.s32.totalorder %s67_s21, 0  ;;  %p78_p2 = scmp.eq.s32.totalorder %s818_s18, 0 }
   0x9   : > { %p618_p4 = scmp.lt.s32.totalorder %s818_s18, 2  ;;  %s173_s23 = sand.u32 1, %s818_s18  }
   0xa   : > { %s887_s22 = scalar_select %p68_p1, %s814_s17, %s70_s20  }
   0xb   : > { %p79_p5 = por %p78_p2, %p77_p0  ;;  %s175_s24 = sand.u32 1, %s814_s17  }
   0xc   : > { %s542_s25 = sshll.u32 %s175_s24, 5  ;;  %s543_s26 = sshll.u32 %s818_s18, 7 }
   0xd   : > { %s900_s29 = scalar_lea.hbm %s1109_s2, %s543_s26  ;;  %s177_s30 = scalar_lea.vmem [#allocation5], %s542_s25 }
   0xe   : > { %s183_s5 = sshll.u32 %s177_s30, 4  ;;  %p902_p6 = pnand %p618_p4, %p79_p5  ;;  %s906_s5 = int_to_ptr.vmem [resolvable:$true] %s183_s5 }
   0xf   : > { %s908_s7 = sshll.u32 %s175_s24, 4  ;;  %s910_s8 = scalar_lea.sflag [#allocation6], %s173_s23 }
  0x10   : > { %s660_s9 = scalar_lea.hbm %s900_s29, 512  ;;  %p662_p8 = pneg %p902_p6 }
  0x11   : > { %p661_p7 = scmp.ne.s32.totalorder %s900_s29, %s660_s9  ;;  %s665_s12 = scalar_lea.hbm %s1109_s2, 1024 }
  0x12   : > { %p666_p11 = scmp.lt.u32.totalorder %s900_s29, %s1109_s2  ;;  %p667_p12 = scmp.lt.u32.totalorder %s665_s12, %s660_s9 }
  0x13   : > { %p663_p9 = pnand %p662_p8, %p661_p7  ;;  %p669_p1 = scmp.lt.u32.totalorder %s660_s9, %s900_s29 }
  0x14   : > { %p668_p13 = por %p667_p12, %p666_p11 }
  0x15   : > { %p664_p10 = pneg %p663_p9 }
  0x16   : > { %p670_p2 = por %p669_p1, %p668_p13 }
  0x18   : > { %p671_p4 = pnand %p670_p2, %p664_p10 }
  0x1a   : > { %674 = shalt.err (!%p671_p4)
}
  0x1b   : > { %s675_s20 = scalar_lea.vmem %s906_s5, 512  ;;  %s820_s21 = smov [#allocation5]  }
  0x1c   : > { %p676_p5 = scmp.ne.s32.totalorder %s906_s5, %s675_s20  ;;  %s680_s23 = sshll.u32 %s820_s21, 4  ;;  %s681_s23 = int_to_ptr.vmem [resolvable:$false] %s680_s23 }
  0x1d   : > { %s682_s24 = scalar_lea.vmem %s681_s23, 1024  ;;  %p683_p3 = scmp.lt.s32.totalorder %s906_s5, %s681_s23 }
  0x1e   : > { %p678_p7 = pnand %p676_p5, %p662_p8  ;;  %p684_p11 = scmp.lt.s32.totalorder %s682_s24, %s675_s20 }
  0x20   : > { %p679_p9 = pneg %p678_p7  ;;  %p685_p12 = por %p684_p11, %p683_p3 }
  0x22   : > { %p686_p13 = pnand %p685_p12, %p679_p9 }
  0x24   : > { %689 = shalt.err (!%p686_p13)
}
  0x25   : > { %s821_s25 = smov 256   ;;  %s822_s27 = smov 128  }
  0x26   : > { %s823_s28 = smov 8   ;;  %s197_s30 = scalar_lea.vmem [#allocation7], %s908_s7 }
  0x27   : > { %609 = dma.hbm_to_vmem [thread:$0]  (!%p902_p6), %s900_s29, 512, %s906_s5, %s910_s8, %s821_s25, %s822_s27, %s823_s28  }
  0x28   : > { %s203_s9 = sshll.u32 %s197_s30, 4  ;;  %s943_s10 = sadd.s32 4294967295, %s818_s18   ;;  %s976_s9 = int_to_ptr.vmem [resolvable:$true] %s203_s9 }
  0x29   : > { %s538_s11 = sadd.s32 4294967294, %s818_s18   ;;  %p83_p3 = scmp.ne.s32.totalorder %s810_s16, %s806_s15 }
  0x2a   : > { %p1112_p10 = scmp.eq.s32.totalorder %s943_s10, 0  ;;  %p133_p1 = scmp.eq.s32.totalorder %s943_s10, 1 }
  0x2b   : > { %p139_p2 = scmp.eq.s32.totalorder %s538_s11, 1  ;;  %p539_p5 = scmp.ge.s32.totalorder %s818_s18, 1 }
  0x2c   : > { %p952_p4 = por %p1112_p10, %p83_p3  ;;  %p960_p7 = por %p133_p1, %p77_p0 }
  0x2d   : > { %p964_p9 = por %p139_p2, %p83_p3  ;;  %p146_p11 = scmp.lt.s32.totalorder %s818_s18, 3 }
  0x2e   : > { %s1117_s12 = scalar_select %p952_p4, 1, 0 }
  0x2f   : > { %s1118_s29 = scalar_select %p960_p7, 1, 0 }
  0x30   : > { %s1119_s5 = scalar_select %p964_p9, 1, 0 }
  0x31   : > { %s974_s14 = scalar_lea.hbm %s1110_s3, %s543_s26  ;;  %p978_p0 = pnand %p539_p5, %p146_p11 }
  0x32   : > { %s824_s21 = smov [#allocation2]   ;;  %s690_s24 = scalar_lea.hbm %s974_s14, 256 }
  0x33   : > { %s1120_s20 = scalar_select %p978_p0, 1, 0 }
  0x34   : > { %s982_s23 = sshll.u32 %s824_s21, 4  ;;  %p691_p13 = scmp.ne.s32.totalorder %s974_s14, %s690_s24  ;;  %s160_s23 = int_to_ptr.vmem [resolvable:$true] %s982_s23 }
  0x35   : > { %s695_s11 = scalar_lea.hbm %s1110_s3, 512  ;;  %p696_p2 = scmp.lt.u32.totalorder %s974_s14, %s1110_s3 }
  0x36   : > { %p693_p3 = pnand %p691_p13, %p662_p8  ;;  %p697_p5 = scmp.lt.u32.totalorder %s695_s11, %s690_s24 }
  0x37   : > { %p699_p10 = scmp.lt.u32.totalorder %s690_s24, %s974_s14 }
  0x38   : > { %p694_p1 = pneg %p693_p3  ;;  %p698_p11 = por %p697_p5, %p696_p2 }
  0x3a   : > { %p700_p9 = por %p699_p10, %p698_p11 }
  0x3c   : > { %p701_p7 = pnand %p700_p9, %p694_p1 }
  0x3e   : > { %704 = shalt.err (!%p701_p7)
}
  0x3f   : > { %s705_s21 = scalar_lea.vmem %s976_s9, 256  ;;  %s825_s26 = smov [#allocation7]  }
  0x40   : > { %p706_p13 = scmp.ne.s32.totalorder %s976_s9, %s705_s21  ;;  %s710_s30 = sshll.u32 %s825_s26, 4  ;;  %s711_s30 = int_to_ptr.vmem [resolvable:$false] %s710_s30 }
  0x41   : > { %s712_s7 = scalar_lea.vmem %s711_s30, 512  ;;  %p713_p4 = scmp.lt.s32.totalorder %s976_s9, %s711_s30 }
  0x42   : > { %p708_p3 = pnand %p706_p13, %p662_p8  ;;  %p714_p2 = scmp.lt.s32.totalorder %s712_s7, %s705_s21 }
  0x44   : > { %p709_p12 = pneg %p708_p3  ;;  %p715_p5 = por %p714_p2, %p713_p4 }
  0x46   : > { %p716_p10 = pnand %p715_p5, %p709_p12 }
  0x48   : > { %719 = shalt.err (!%p716_p10)
}
  0x49   : > { %612 = dma.hbm_to_vmem [thread:$0]  (!%p902_p6), %s974_s14, 256, %s976_s9, %s910_s8, %s821_s25, %s822_s27, %s823_s28  }
  0x4a   : > { %p1121_p8 = scmp.eq.s32.totalorder %s943_s10, 0  ;;  %p1122_p7 = pneg %p978_p0 }
  0x4b   : > { %s720_s13 = scalar_lea.hbm %s1107_s0, 32 }
  0x4c   : > { %p1019_p9 = pnand %p1122_p7, %p1121_p8  ;;  %p721_p4 = scmp.ne.s32.totalorder %s1107_s0, %s720_s13 }
  0x4d   : > { %p727_p11 = scmp.lt.u32.totalorder %s720_s13, %s1107_s0 }
  0x4e   : > { %p722_p12 = pneg %p1019_p9 }
  0x50   : > { %p723_p6 = pnand %p722_p12, %p721_p4 }
  0x52   : > { %p724_p1 = pneg %p723_p6 }
  0x54   : > { %p729_p13 = pnand %p727_p11, %p724_p1 }
  0x56   : > { %732 = shalt.err (!%p729_p13)
}
  0x57   : > { %s733_s27 = scalar_lea.vmem %s160_s23, 32  ;;  %p741_p10 = scmp.lt.s32.totalorder %s160_s23, %s160_s23 }
  0x58   : > { %p734_p3 = scmp.ne.s32.totalorder %s160_s23, %s733_s27  ;;  %p742_p8 = scmp.lt.s32.totalorder %s733_s27, %s733_s27 }
  0x5a   : > { %p736_p2 = pnand %p734_p3, %p722_p12  ;;  %p743_p7 = por %p742_p8, %p741_p10 }
  0x5c   : > { %p737_p5 = pneg %p736_p2 }
  0x5e   : > { %p744_p0 = pnand %p743_p7, %p737_p5 }
  0x60   : > { %747 = shalt.err (!%p744_p0)
}
  0x61   : > { %605 = dma.hbm_to_vmem [thread:$0]  (!%p1019_p9), %s1107_s0, 32, %s160_s23, [#allocation3]  }
  0x62   : > { %p1124_p4 = scmp.ne.s32.totalorder %s1120_s20, 0 }
  0x63   : > { %p1125_p6 = scmp.eq.s32.totalorder (!%p1124_p4), %s943_s10, 0 }
  0x64   : > { %215 = sbr.rel (%p1124_p4) target bundleno = 350 (0x15e), region = 36 }
  0x6b   : > { %793 = dma.done.wait (%p1125_p6), [#allocation3], 32   ;;  %p1126_p12 = pmov %p1125_p6 }
  0x6c   : > { %s221_s14 = sand.u32 1, %s943_s10   ;;  %s1047_s30 = sand.u32 1, %s810_s16  }
  0x6d   : > { %795 = vsyncadd (%p1126_p12), [#allocation3], 4294967264  ;;  %s548_s7 = sshll.u32 %s1047_s30, 5  ;;  %s222_s24 = scalar_lea.sflag [#allocation6], %s221_s14 }
  0x6e   : > { %s225_s11 = scalar_lea.vmem [#allocation5], %s548_s7  ;;  %p1127_p0 = scmp.ne.s32.totalorder %s1117_s12, 0 }
  0x70   : > { %797 = dma.done.wait (%p1127_p0), %s222_s24, 768  }
  0x71   : > { %799 = vsyncadd (%p1127_p0), %s222_s24, 4294966528  ;;  %v826_v0 = vmov 0.0|0.0   ;;  %s549_s20 = sshll.u32 %s1047_s30, 4  ;;  %vm827_vm0 = vmmov 0   ;;  %v828_v1 = vmov 0.0   ;;  %v265_v2 = vld [vmem:[%s225_s11] sm:$0xff] }
  0x72   : > { %583 = vmatprep.subr.bf16.mxu0 %v826_v0  ;;  %589 = vmatprep.subr.bf16.mxu1 %v826_v0  ;;  %v266_v3 = vld [vmem:[%s225_s11 + $0x8] sm:$0xff]  ;;  %s234_s23 = scalar_lea.vmem [#allocation7], %s549_s20  ;;  %v267_v7 = vld [vmem:[%s225_s11 + $0x10] sm:$0xff]  ;;  %v268_v8 = vld [vmem:[%s225_s11 + $0x18] sm:$0xff]  ;;  %vm346_vm1 = vcmask 130048   ;;  %vm269_vm2 = vcmask 261120  }
  0x73   : > { %580 = vmatprep.mubr.msk.f32.mxu1 %vm827_vm0, %v828_v1  ;;  %573 = vmatprep.mubr.msk.f32.mxu0 %vm827_vm0, %v828_v1  ;;  %v344_v4 = vld [vmem:[%s234_s23] sm:$0xff]  ;;  %v584_v5 = vpack.c.bf16 %v266_v3, %v265_v2  ;;  %v345_v6 = vld [vmem:[%s234_s23 + $0x8] sm:$0xff]  ;;  %v587_v10 = vpack.c.bf16 %v268_v8, %v267_v7  ;;  %s550_s13 = sshll.u32 %s1047_s30, 2  ;;  %s554_s8 = sshll.u32 %s943_s10, 6 }
  0x74   : > { %v590_v9 = vpack.c.bf16 %v345_v6, %v344_v4  ;;  %v343_v11 = vld [vmem:[%s1108_s1] sm:$0x3]  ;;  %s263_s21 = scalar_lea.vmem [#allocation8], %s550_s13  ;;  %s1065_s28 = scalar_lea.hbm %s1111_s4, %s554_s8 }
  0x75   : > { %585 = vmatpush3.bf16.msra.mxu0 %v584_v5  ;;  %v264_v12 = vld [vmem:[#allocation2] sm:$0x3]  ;;  %s436_s26 = sshll.u32 %s263_s21, 4  ;;  %s423_s9 = scalar_lea.sflag [#allocation4], %s1047_s30  ;;  %s1060_s26 = int_to_ptr.vmem [resolvable:$true] %s436_s26 }
  0x76   : > { %586 = vmatprep.subr.bf16.mxu0 %v826_v0  ;;  %591 = vmatpush3.bf16.msra.mxu1 %v590_v9  ;;  %s748_s14 = scalar_lea.vmem %s1060_s26, 64  ;;  %p1128_p1 = scmp.ne.s32.totalorder %s1118_s29, 0 }
  0x77   : > { %p749_p9 = scmp.ne.s32.totalorder %s1060_s26, %s748_s14  ;;  %s829_s10 = smov [#allocation8]  }
  0x78   : > { %s752_s7 = sshll.u32 %s829_s10, 4  ;;  %s753_s7 = int_to_ptr.vmem [resolvable:$false] %s752_s7 }
  0x79   : > { %588 = vmatpush3.bf16.msra.mxu0 %v587_v10  ;;  %581 = vmatmul.mubr.msk.f32.vlgmr.msra.gmra.mrb[0].mxu1 %vm346_vm1, %v343_v11  ;;  %p750_p11 = pnand %p749_p9, %p1128_p1  ;;  %s754_s24 = scalar_lea.vmem %s753_s7, 128 }
  0x7a   : > { %p755_p3 = scmp.lt.s32.totalorder %s1060_s26, %s753_s7  ;;  %p756_p2 = scmp.lt.s32.totalorder %s754_s24, %s748_s14 }
  0x7b   : > { %p751_p13 = pneg %p750_p11 }
  0x7c   : > { %574 = vmatmul.mubr.msk.f32.vlgmr.msra.gmra.mrb[0].mxu0 %vm269_vm2, %v264_v12  ;;  %p757_p5 = por %p756_p2, %p755_p3 }
  0x7e   : > { %p758_p10 = pnand %p757_p5, %p751_p13 }
 0x14c   : > { %v416_v13 = vpop.f32.mrb[0].mxu1 }
 0x14d   : > { %421 = vst [vmem:[%s263_s21 + $0x2] sm:$0x3] %v416_v13  ;;  %v582_v14 = vpop.f32.mrb[1].mxu1 }
 0x14f   : > { %v339_v15 = vpop.f32.mrb[0].mxu0 }
 0x150   : > { %420 = vst [vmem:[%s263_s21] sm:$0x3] %v339_v15  ;;  %v575_v16 = vpop.f32.mrb[1].mxu0 }
 0x151   : > { %761 = shalt.err (!%p758_p10)
}
 0x152   : > { %s762_s30 = scalar_lea.hbm %s1065_s28, 64  ;;  %s766_s23 = scalar_lea.hbm %s1111_s4, 128 }
 0x153   : > { %p763_p8 = scmp.ne.s32.totalorder %s1065_s28, %s762_s30  ;;  %p767_p6 = scmp.lt.u32.totalorder %s1065_s28, %s1111_s4 }
 0x154   : > { %p768_p12 = scmp.lt.u32.totalorder %s766_s23, %s762_s30  ;;  %p770_p9 = scmp.lt.u32.totalorder %s762_s30, %s1065_s28 }
 0x155   : > { %p764_p7 = pnand %p763_p8, %p1128_p1 }
 0x156   : > { %p769_p0 = por %p768_p12, %p767_p6 }
 0x157   : > { %p765_p4 = pneg %p764_p7 }
 0x158   : > { %p771_p11 = por %p770_p9, %p769_p0 }
 0x15a   : > { %p772_p13 = pnand %p771_p11, %p765_p4 }
 0x15c   : > { %775 = shalt.err (!%p772_p13)
}
 0x15d   : > { %600 = dma.vmem_to_hbm [thread:$0]  (%p1128_p1), %s1060_s26, 64, %s1065_s28, %s423_s9  }
 0x15e PF: > { %s448_s13 = sand.u32 1, %s806_s15   ;;  %p1129_p3 = scmp.ne.s32.totalorder %s1119_s5, 0 }
 0x15f   : > { %p1130_p2 = scmp.ge.s32.totalorder %s818_s18, 2  ;;  %s449_s21 = scalar_lea.sflag [#allocation4], %s448_s13 }
 0x161   : > { %p614_p5 = pnand %p1130_p2, %p1129_p3 }
 0x163   : > { %801 = dma.done.wait (!%p614_p5), %s449_s21, 64  }
 0x164   : > { %803 = vsyncadd (!%p614_p5), %s449_s21, 4294967232  ;;  %p18_p10 = scmp.ge.s32.totalorder %s876_s19, 4   ;;  %s1131_s15 = smov %s810_s16 }
 0x165   : > { %s1132_s16 = smov %s814_s17  ;;  %s1133_s17 = smov %s887_s22 }
 0x166   : > { %s1134_s18 = smov %s876_s19  ;;  %20 = sbr.rel (!%p18_p10) target bundleno = 6 (0x6), region = 97 }
 0x16d   :  { %454 = vsyncpa [#allocation3], 1 }
 0x16e   :  { %456 = vsyncpa [#allocation3 + $0x1], 1 }
 0x16f   :  { %457 = vsyncpa [#allocation6], 1 }
 0x170   :  { %459 = vsyncpa [#allocation6 + $0x1], 1 }
 0x171   :  { %460 = vsyncpa [#allocation4], 1 }
 0x172   :  { %462 = vsyncpa [#allocation4 + $0x1], 1 }

</bundles_post_ra>
